<compile_context>
chip_gen: v6e
topology: v6e:2x2x1
jax: 0.10.0
libtpu: 0.0.40
codegen_flags: <defaults>
</compile_context>

<pallas_src>
import functools

import jax
import jax.numpy as jnp
import numpy as np
from jax import lax
from jax.experimental import pallas as pl
from jax.experimental.pallas import tpu as pltpu

WINDOW_SIZE = 10
VARIANCE_THRESHOLD = 0.1


def _roll_left(x, k, size):
    # y[:, i] = x[:, (i + k) % size]
    if k == 0:
        return x
    return pltpu.roll(x, shift=size - k, axis=1)


def _rsum(x):
    # full reduction -> (1, 1), done as two single-axis reductions
    return jnp.sum(jnp.sum(x, axis=1, keepdims=True), axis=0, keepdims=True)


def _combined_loss_kernel(pred_ref, true_ref, out_ref, *,
                          max_gradient_threshold, gradient_weight,
                          homogeneous_penalty, transition_penalty,
                          smoothing_weight, temporal_weight):
    p = pred_ref[...].astype(jnp.float32)
    t = true_ref[...].astype(jnp.float32)
    B, S = p.shape
    col = lax.broadcasted_iota(jnp.int32, (B, S), 1)
    W = WINDOW_SIZE

    d = p - t
    c_mse = 1.0 / (B * S)

    if S == 1:
        # PyTorch forward returns plain MSE when seq_len == 1
        adaptive = _rsum(d * d) * c_mse
        temporal = jnp.zeros((1, 1), jnp.float32)
    else:
        # ---------------- detect_zones(true) ----------------
        if S <= W:
            homog = jnp.zeros((B, S), jnp.float32)
        else:
            L = S - W + 1
            # Center per row: variance is shift-invariant, f32 conditioning improves.
            t_c = t - jnp.sum(t, axis=1, keepdims=True) * (1.0 / S)
            # Banded-ones matrix A[i, j] = 1 iff 0 <= i - j < W; windowed sums on MXU.
            ri = lax.broadcasted_iota(jnp.int32, (S, S), 0)
            cj = lax.broadcasted_iota(jnp.int32, (S, S), 1)
            band = jnp.logical_and(ri >= cj, ri < cj + W).astype(jnp.float32)
            s1 = jnp.dot(t_c, band, precision=lax.Precision.HIGHEST,
                         preferred_element_type=jnp.float32)
            s2 = jnp.dot(t_c * t_c, band, precision=lax.Precision.HIGHEST,
                         preferred_element_type=jnp.float32)
            # unbiased variance (torch.var default), valid for lanes [0, L)
            var_full = (s2 - s1 * s1 * (1.0 / W)) * (1.0 / (W - 1))
            pad_left = W // 2
            first = jnp.broadcast_to(var_full[:, 0:1], (B, S))
            last = jnp.broadcast_to(_roll_left(var_full, L - 1, S)[:, 0:1], (B, S))
            mid = pltpu.roll(var_full, shift=pad_left, axis=1)  # mid[:, j] = var[:, j - pad_left]
            padded = jnp.where(col < pad_left, first,
                               jnp.where(col >= pad_left + L, last, mid))
            maxv = jnp.max(padded, axis=1, keepdims=True)
            # normalized < thr  <=>  padded < thr * (maxv + eps)   (divide-free)
            homog = (padded < VARIANCE_THRESHOLD * (maxv + 1e-8)).astype(jnp.float32)

        # ------------- gradient / pattern losses -------------
        # Hoisted shift-by-1 rolls, reused below.
        p1 = _roll_left(p, 1, S)
        t1 = _roll_left(t, 1, S)
        h1 = _roll_left(homog, 1, S)
        valid1 = (col < (S - 1)).astype(jnp.float32)

        d1p = p1 - p                       # pred first differences (unmasked, reused)
        pred_diffs = jnp.abs(d1p) * valid1
        true_diffs = jnp.abs(t1 - t) * valid1
        zone = h1 * valid1                 # homogeneous_zones[:, 1:]
        trans = (1.0 - h1) * valid1        # ~zone_masks
        thr = jnp.maximum(true_diffs, max_gradient_threshold)
        excess = jnp.maximum(pred_diffs * trans - thr, 0.0)

        n1 = B * (S - 1)
        c_pat = 0.3 / n1
        c_hom = homogeneous_penalty * gradient_weight / n1
        c_trn = transition_penalty * gradient_weight / n1

        # Fuse mse + pattern + homogeneous + transition into ONE reduction.
        adapt_elem = ((d * d) * c_mse
                      + (pred_diffs - true_diffs) ** 2 * c_pat
                      + (pred_diffs * zone) ** 2 * c_hom
                      + (excess * excess) * c_trn)
        adaptive = _rsum(adapt_elem)

        # ------------- temporal smoothing -------------
        if S < 3:
            temporal = jnp.zeros((1, 1), jnp.float32)
        else:
            valid2 = (col < (S - 2)).astype(jnp.float32)
            second = (_roll_left(d1p, 1, S) - d1p) * valid2
            temporal = _rsum(second * second) * (smoothing_weight / (B * (S - 2)))

    total = adaptive + temporal * temporal_weight

    # Single lane-dense output row: lanes 0/1/2 = adaptive/temporal/total.
    lane = lax.broadcasted_iota(jnp.int32, out_ref.shape, 1)
    out_ref[...] = (jnp.where(lane == 0, adaptive, 0.0)
                    + jnp.where(lane == 1, temporal, 0.0)
                    + jnp.where(lane == 2, total, 0.0))


def combined_adaptive_loss(impedance_pred, impedance_true, config=None):
    """Pallas implementation of CombinedAdaptiveLoss.forward (jit-friendly).

    Returns (total_loss, loss_components); components are device scalars
    (no .item()/float() host syncs — convert on the host only when needed).
    """
    if config is None:
        config = {}
    kernel = functools.partial(
        _combined_loss_kernel,
        max_gradient_threshold=float(config.get('max_gradient_threshold', 0.12)),
        gradient_weight=float(config.get('gradient_weight', 0.25)),
        homogeneous_penalty=2.0,
        transition_penalty=0.5,
        smoothing_weight=float(config.get('temporal_smoothing_weight', 0.05)),
        temporal_weight=float(config.get('temporal_loss_weight', 0.1)),
    )
    out = pl.pallas_call(
        kernel,
        out_shape=jax.ShapeDtypeStruct((1, 128), jnp.float32),
        in_specs=[pl.BlockSpec(memory_space=pltpu.MemorySpace.VMEM),
                  pl.BlockSpec(memory_space=pltpu.MemorySpace.VMEM)],
        out_specs=pl.BlockSpec(memory_space=pltpu.MemorySpace.VMEM),
    )(impedance_pred, impedance_true)
    adaptive = out[0, 0]
    temporal = out[0, 1]
    total = out[0, 2]
    loss_components = {'adaptive': adaptive, 'temporal': temporal, 'total': total}
    return total, loss_components


def _reference_loss(pred, true, config=None):
    """Pure-JAX mirror of the PyTorch module (for correctness checking)."""
    if config is None:
        config = {}
    mgt = config.get('max_gradient_threshold', 0.12)
    gw = config.get('gradient_weight', 0.25)
    sw = config.get('temporal_smoothing_weight', 0.05)
    tw = config.get('temporal_loss_weight', 0.1)
    pred = pred.astype(jnp.float32)
    true = true.astype(jnp.float32)
    B, S = pred.shape
    mse = jnp.mean((pred - true) ** 2)

    W = WINDOW_SIZE
    if S <= W:
        homog = jnp.zeros((B, S), bool)
    else:
        L = S - W + 1
        s1 = jnp.zeros((B, L), jnp.float32)
        s2 = jnp.zeros((B, L), jnp.float32)
        for k in range(W):
            w = true[:, k:k + L]
            s1 = s1 + w
            s2 = s2 + w * w
        var = (s2 - s1 * s1 / W) / (W - 1)
        pad_left = W // 2
        pad_right = W - pad_left - 1
        padded = jnp.concatenate(
            [jnp.broadcast_to(var[:, :1], (B, pad_left)), var,
             jnp.broadcast_to(var[:, -1:], (B, pad_right))], axis=1)
        maxv = jnp.max(padded, axis=1, keepdims=True)
        homog = (padded / (maxv + 1e-8)) < VARIANCE_THRESHOLD

    td = jnp.abs(true[:, 1:] - true[:, :-1])
    pd = jnp.abs(pred[:, 1:] - pred[:, :-1])
    pattern = jnp.mean((pd - td) ** 2)
    zone = homog[:, 1:].astype(jnp.float32)
    hom_loss = jnp.mean((pd * zone) ** 2) * 2.0
    trans = 1.0 - zone
    thr = jnp.maximum(td, mgt)
    excess = jnp.maximum(pd * trans - thr, 0.0)
    trans_loss = jnp.mean(excess ** 2) * 0.5
    adaptive = mse + pattern * 0.3 + (hom_loss + trans_loss) * gw

    if S < 3:
        temporal = jnp.float32(0.0)
    else:
        fd = pred[:, 1:] - pred[:, :-1]
        sd = fd[:, 1:] - fd[:, :-1]
        temporal = jnp.mean(sd ** 2) * sw
    total = adaptive + temporal * tw
    return total, adaptive, temporal


if __name__ == "__main__":
    key = jax.random.PRNGKey(0)
    k1, k2 = jax.random.split(key)
    B, S = 8, 128  # seq > window_size=10 so the zone-detection path is exercised

    # Synthetic impedance: smooth drift + a step (homogeneous + transition zones)
    base = jnp.cumsum(jax.random.normal(k1, (B, S), dtype=jnp.float32) * 0.05, axis=1)
    step = (jnp.arange(S) >= S // 2).astype(jnp.float32) * 1.5
    impedance_true = base + step[None, :]
    impedance_pred = impedance_true + 0.1 * jax.random.normal(k2, (B, S), dtype=jnp.float32)

    # Whole wrapper is jittable now (no host readbacks inside).
    loss_fn = jax.jit(combined_adaptive_loss)
    total_loss, components = loss_fn(impedance_pred, impedance_true)
    total_loss, components = jax.block_until_ready((total_loss, components))

    ref_total, ref_adaptive, ref_temporal = _reference_loss(impedance_pred, impedance_true)
    np.testing.assert_allclose(float(total_loss), float(ref_total), rtol=2e-5, atol=1e-6)
    np.testing.assert_allclose(float(components['adaptive']), float(ref_adaptive),
                               rtol=2e-5, atol=1e-6)
    np.testing.assert_allclose(float(components['temporal']), float(ref_temporal),
                               rtol=2e-5, atol=1e-6)

    print("KERNEL_OK")
</pallas_src>

<mosaic_0001>
module attributes {stable_mosaic.version = 11 : i64} {
  func.func @_combined_loss_kernel(%arg0: memref<8x128xf32, #tpu.memory_space<vmem>>, %arg1: memref<8x128xf32, #tpu.memory_space<vmem>>, %arg2: memref<1x128xf32, #tpu.memory_space<vmem>>) attributes {dimension_semantics = [], scalar_prefetch = 0 : i64, scratch_operands = 0 : i64, tpu.core_type = #tpu.core_type<tc>} {
    %c0 = arith.constant 0 : index
    %c0_0 = arith.constant 0 : index
    %0 = vector.load %arg0[%c0, %c0_0] : memref<8x128xf32, #tpu.memory_space<vmem>>, vector<8x128xf32>
    %c0_1 = arith.constant 0 : index
    %c0_2 = arith.constant 0 : index
    %1 = vector.load %arg1[%c0_1, %c0_2] : memref<8x128xf32, #tpu.memory_space<vmem>>, vector<8x128xf32>
    %2 = tpu.iota {dimensions = array<i32: 1>} : vector<8x128xi32>
    %3 = arith.subf %0, %1 : vector<8x128xf32>
    %cst = arith.constant dense<0.000000e+00> : vector<8xf32>
    %4 = vector.multi_reduction <add>, %1, %cst [1] : vector<8x128xf32> to vector<8xf32>
    %5 = vector.shape_cast %4 : vector<8xf32> to vector<8x1xf32>
    %cst_3 = arith.constant 7.812500e-03 : f32
    %6 = vector.broadcast %cst_3 : f32 to vector<8x1xf32>
    %7 = arith.mulf %5, %6 : vector<8x1xf32>
    %8 = vector.broadcast %7 : vector<8x1xf32> to vector<8x128xf32>
    %9 = arith.subf %1, %8 : vector<8x128xf32>
    %10 = tpu.iota {dimensions = array<i32: 0>} : vector<128x128xi32>
    %11 = tpu.iota {dimensions = array<i32: 1>} : vector<128x128xi32>
    %12 = arith.cmpi sge, %10, %11 : vector<128x128xi32>
    %c10_i32 = arith.constant 10 : i32
    %13 = vector.broadcast %c10_i32 : i32 to vector<128x128xi32>
    %14 = arith.addi %11, %13 : vector<128x128xi32>
    %15 = arith.cmpi slt, %10, %14 : vector<128x128xi32>
    %16 = arith.andi %12, %15 : vector<128x128xi1>
    %17 = arith.extui %16 : vector<128x128xi1> to vector<128x128xi32>
    %18 = arith.sitofp %17 : vector<128x128xi32> to vector<128x128xf32>
    %cst_4 = arith.constant dense<0.000000e+00> : vector<8x128xf32>
    %19 = tpu.matmul %9, %18, %cst_4 {dimension_numbers = #tpu.dot_dimension_numbers<[1], [0], [0], [1], [0, 0, 1, 1], [], []>, precision = #tpu.contract_precision<fp32>} : vector<8x128xf32>, vector<128x128xf32>, vector<8x128xf32> -> vector<8x128xf32>
    %20 = arith.mulf %9, %9 : vector<8x128xf32>
    %cst_5 = arith.constant dense<0.000000e+00> : vector<8x128xf32>
    %21 = tpu.matmul %20, %18, %cst_5 {dimension_numbers = #tpu.dot_dimension_numbers<[1], [0], [0], [1], [0, 0, 1, 1], [], []>, precision = #tpu.contract_precision<fp32>} : vector<8x128xf32>, vector<128x128xf32>, vector<8x128xf32> -> vector<8x128xf32>
    %22 = arith.mulf %19, %19 : vector<8x128xf32>
    %cst_6 = arith.constant 1.000000e-01 : f32
    %23 = vector.broadcast %cst_6 : f32 to vector<8x128xf32>
    %24 = arith.mulf %22, %23 : vector<8x128xf32>
    %25 = arith.subf %21, %24 : vector<8x128xf32>
    %cst_7 = arith.constant 0.111111112 : f32
    %26 = vector.broadcast %cst_7 : f32 to vector<8x128xf32>
    %27 = arith.mulf %25, %26 : vector<8x128xf32>
    %28 = vector.extract_strided_slice %27 {offsets = [0, 0], sizes = [8, 1], strides = [1, 1]} : vector<8x128xf32> to vector<8x1xf32>
    %29 = vector.shape_cast %28 : vector<8x1xf32> to vector<8x1xf32>
    %30 = vector.broadcast %29 : vector<8x1xf32> to vector<8x128xf32>
    %c10_i32_8 = arith.constant 10 : i32
    %31 = tpu.dynamic_rotate %27 by %c10_i32_8 dim 1 : vector<8x128xf32>, i32 -> vector<8x128xf32>
    %32 = vector.extract_strided_slice %31 {offsets = [0, 0], sizes = [8, 1], strides = [1, 1]} : vector<8x128xf32> to vector<8x1xf32>
    %33 = vector.shape_cast %32 : vector<8x1xf32> to vector<8x1xf32>
    %34 = vector.broadcast %33 : vector<8x1xf32> to vector<8x128xf32>
    %c5_i32 = arith.constant 5 : i32
    %35 = tpu.dynamic_rotate %27 by %c5_i32 dim 1 : vector<8x128xf32>, i32 -> vector<8x128xf32>
    %c5_i32_9 = arith.constant 5 : i32
    %36 = vector.broadcast %c5_i32_9 : i32 to vector<8x128xi32>
    %37 = arith.cmpi slt, %2, %36 : vector<8x128xi32>
    %c124_i32 = arith.constant 124 : i32
    %38 = vector.broadcast %c124_i32 : i32 to vector<8x128xi32>
    %39 = arith.cmpi sge, %2, %38 : vector<8x128xi32>
    %40 = arith.select %39, %34, %35 : vector<8x128xi1>, vector<8x128xf32>
    %41 = arith.select %37, %30, %40 : vector<8x128xi1>, vector<8x128xf32>
    %cst_10 = arith.constant dense<0xFF800000> : vector<8xf32>
    %42 = vector.multi_reduction <maximumf>, %41, %cst_10 [1] : vector<8x128xf32> to vector<8xf32>
    %43 = vector.shape_cast %42 : vector<8xf32> to vector<8x1xf32>
    %cst_11 = arith.constant 9.99999993E-9 : f32
    %44 = vector.broadcast %cst_11 : f32 to vector<8x1xf32>
    %45 = arith.addf %43, %44 : vector<8x1xf32>
    %cst_12 = arith.constant 1.000000e-01 : f32
    %46 = vector.broadcast %cst_12 : f32 to vector<8x1xf32>
    %47 = arith.mulf %46, %45 : vector<8x1xf32>
    %48 = vector.broadcast %47 : vector<8x1xf32> to vector<8x128xf32>
    %49 = arith.cmpf olt, %41, %48 : vector<8x128xf32>
    %50 = arith.extui %49 : vector<8x128xi1> to vector<8x128xi32>
    %51 = arith.sitofp %50 : vector<8x128xi32> to vector<8x128xf32>
    %c127_i32 = arith.constant 127 : i32
    %52 = tpu.dynamic_rotate %0 by %c127_i32 dim 1 : vector<8x128xf32>, i32 -> vector<8x128xf32>
    %c127_i32_13 = arith.constant 127 : i32
    %53 = tpu.dynamic_rotate %1 by %c127_i32_13 dim 1 : vector<8x128xf32>, i32 -> vector<8x128xf32>
    %c127_i32_14 = arith.constant 127 : i32
    %54 = tpu.dynamic_rotate %51 by %c127_i32_14 dim 1 : vector<8x128xf32>, i32 -> vector<8x128xf32>
    %c127_i32_15 = arith.constant 127 : i32
    %55 = vector.broadcast %c127_i32_15 : i32 to vector<8x128xi32>
    %56 = arith.cmpi slt, %2, %55 : vector<8x128xi32>
    %57 = arith.extui %56 : vector<8x128xi1> to vector<8x128xi32>
    %58 = arith.sitofp %57 : vector<8x128xi32> to vector<8x128xf32>
    %59 = arith.subf %52, %0 : vector<8x128xf32>
    %60 = math.absf %59 : vector<8x128xf32>
    %61 = arith.mulf %60, %58 : vector<8x128xf32>
    %62 = arith.subf %53, %1 : vector<8x128xf32>
    %63 = math.absf %62 : vector<8x128xf32>
    %64 = arith.mulf %63, %58 : vector<8x128xf32>
    %65 = arith.mulf %54, %58 : vector<8x128xf32>
    %cst_16 = arith.constant 1.000000e+00 : f32
    %66 = vector.broadcast %cst_16 : f32 to vector<8x128xf32>
    %67 = arith.subf %66, %54 : vector<8x128xf32>
    %68 = arith.mulf %67, %58 : vector<8x128xf32>
    %cst_17 = arith.constant 1.200000e-01 : f32
    %69 = vector.broadcast %cst_17 : f32 to vector<8x128xf32>
    %70 = arith.maximumf %64, %69 : vector<8x128xf32>
    %71 = arith.mulf %61, %68 : vector<8x128xf32>
    %72 = arith.subf %71, %70 : vector<8x128xf32>
    %cst_18 = arith.constant 0.000000e+00 : f32
    %73 = vector.broadcast %cst_18 : f32 to vector<8x128xf32>
    %74 = arith.maximumf %72, %73 : vector<8x128xf32>
    %75 = arith.mulf %3, %3 : vector<8x128xf32>
    %cst_19 = arith.constant 9.765625E-4 : f32
    %76 = vector.broadcast %cst_19 : f32 to vector<8x128xf32>
    %77 = arith.mulf %75, %76 : vector<8x128xf32>
    %78 = arith.subf %61, %64 : vector<8x128xf32>
    %79 = arith.mulf %78, %78 : vector<8x128xf32>
    %cst_20 = arith.constant 2.95275589E-4 : f32
    %80 = vector.broadcast %cst_20 : f32 to vector<8x128xf32>
    %81 = arith.mulf %79, %80 : vector<8x128xf32>
    %82 = arith.addf %77, %81 : vector<8x128xf32>
    %83 = arith.mulf %61, %65 : vector<8x128xf32>
    %84 = arith.mulf %83, %83 : vector<8x128xf32>
    %cst_21 = arith.constant 4.921260e-04 : f32
    %85 = vector.broadcast %cst_21 : f32 to vector<8x128xf32>
    %86 = arith.mulf %84, %85 : vector<8x128xf32>
    %87 = arith.addf %82, %86 : vector<8x128xf32>
    %88 = arith.mulf %74, %74 : vector<8x128xf32>
    %cst_22 = arith.constant 1.23031496E-4 : f32
    %89 = vector.broadcast %cst_22 : f32 to vector<8x128xf32>
    %90 = arith.mulf %88, %89 : vector<8x128xf32>
    %91 = arith.addf %87, %90 : vector<8x128xf32>
    %cst_23 = arith.constant dense<0.000000e+00> : vector<8xf32>
    %92 = vector.multi_reduction <add>, %91, %cst_23 [1] : vector<8x128xf32> to vector<8xf32>
    %93 = vector.shape_cast %92 : vector<8xf32> to vector<8x1xf32>
    %cst_24 = arith.constant dense<0.000000e+00> : vector<1xf32>
    %94 = vector.multi_reduction <add>, %93, %cst_24 [0] : vector<8x1xf32> to vector<1xf32>
    %95 = vector.shape_cast %94 : vector<1xf32> to vector<1x1xf32>
    %c126_i32 = arith.constant 126 : i32
    %96 = vector.broadcast %c126_i32 : i32 to vector<8x128xi32>
    %97 = arith.cmpi slt, %2, %96 : vector<8x128xi32>
    %98 = arith.extui %97 : vector<8x128xi1> to vector<8x128xi32>
    %99 = arith.sitofp %98 : vector<8x128xi32> to vector<8x128xf32>
    %c127_i32_25 = arith.constant 127 : i32
    %100 = tpu.dynamic_rotate %59 by %c127_i32_25 dim 1 : vector<8x128xf32>, i32 -> vector<8x128xf32>
    %101 = arith.subf %100, %59 : vector<8x128xf32>
    %102 = arith.mulf %101, %99 : vector<8x128xf32>
    %103 = arith.mulf %102, %102 : vector<8x128xf32>
    %cst_26 = arith.constant dense<0.000000e+00> : vector<8xf32>
    %104 = vector.multi_reduction <add>, %103, %cst_26 [1] : vector<8x128xf32> to vector<8xf32>
    %105 = vector.shape_cast %104 : vector<8xf32> to vector<8x1xf32>
    %cst_27 = arith.constant dense<0.000000e+00> : vector<1xf32>
    %106 = vector.multi_reduction <add>, %105, %cst_27 [0] : vector<8x1xf32> to vector<1xf32>
    %107 = vector.shape_cast %106 : vector<1xf32> to vector<1x1xf32>
    %cst_28 = arith.constant 4.96031753E-5 : f32
    %108 = vector.broadcast %cst_28 : f32 to vector<1x1xf32>
    %109 = arith.mulf %107, %108 : vector<1x1xf32>
    %cst_29 = arith.constant 1.000000e-01 : f32
    %110 = vector.broadcast %cst_29 : f32 to vector<1x1xf32>
    %111 = arith.mulf %109, %110 : vector<1x1xf32>
    %112 = arith.addf %95, %111 : vector<1x1xf32>
    %113 = tpu.iota {dimensions = array<i32: 1>} : vector<1x128xi32>
    %c0_i32 = arith.constant 0 : i32
    %114 = vector.broadcast %c0_i32 : i32 to vector<1x128xi32>
    %115 = arith.cmpi eq, %113, %114 : vector<1x128xi32>
    %cst_30 = arith.constant 0.000000e+00 : f32
    %116 = vector.shape_cast %95 : vector<1x1xf32> to vector<1x1xf32>
    %117 = vector.broadcast %116 : vector<1x1xf32> to vector<1x128xf32>
    %118 = vector.broadcast %cst_30 : f32 to vector<1x128xf32>
    %119 = arith.select %115, %117, %118 : vector<1x128xi1>, vector<1x128xf32>
    %c1_i32 = arith.constant 1 : i32
    %120 = vector.broadcast %c1_i32 : i32 to vector<1x128xi32>
    %121 = arith.cmpi eq, %113, %120 : vector<1x128xi32>
    %cst_31 = arith.constant 0.000000e+00 : f32
    %122 = vector.shape_cast %109 : vector<1x1xf32> to vector<1x1xf32>
    %123 = vector.broadcast %122 : vector<1x1xf32> to vector<1x128xf32>
    %124 = vector.broadcast %cst_31 : f32 to vector<1x128xf32>
    %125 = arith.select %121, %123, %124 : vector<1x128xi1>, vector<1x128xf32>
    %126 = arith.addf %119, %125 : vector<1x128xf32>
    %c2_i32 = arith.constant 2 : i32
    %127 = vector.broadcast %c2_i32 : i32 to vector<1x128xi32>
    %128 = arith.cmpi eq, %113, %127 : vector<1x128xi32>
    %cst_32 = arith.constant 0.000000e+00 : f32
    %129 = vector.shape_cast %112 : vector<1x1xf32> to vector<1x1xf32>
    %130 = vector.broadcast %129 : vector<1x1xf32> to vector<1x128xf32>
    %131 = vector.broadcast %cst_32 : f32 to vector<1x128xf32>
    %132 = arith.select %128, %130, %131 : vector<1x128xi1>, vector<1x128xf32>
    %133 = arith.addf %126, %132 : vector<1x128xf32>
    %c0_33 = arith.constant 0 : index
    %c0_34 = arith.constant 0 : index
    %134 = vector.load %arg2[%c0_33, %c0_34] : memref<1x128xf32, #tpu.memory_space<vmem>>, vector<1x128xf32>
    tpu.vector_store %arg2[%c0_33, %c0_34], %133 {strides = array<i32>} : memref<1x128xf32, #tpu.memory_space<vmem>>, vector<1x128xf32>,
    return
  }
}

</mosaic_0001>

<bundles_post_ra>
// kernel: combined_adaptive_loss.1
= control target key start
LH: loop header
LB: loop body
LE: loop exit
PB: predicated region body
PF: predicated region fallthrough
CT: control target
= control target key end

     0   :  { %7 = vsyncpa [#allocation3], 0  ;;  %s3335_s0 = inlined_call_operand.hbm [shape: f32[8,128], index: 0, kind: input, shape index: {}]   ;;  %s3336_s1 = inlined_call_operand.hbm [shape: f32[8,128], index: 1, kind: input, shape index: {}]   ;;  %s3337_s2 = inlined_call_operand.vmem [shape: f32[1,128], index: 2, kind: output, shape index: {}]  }
   0x1   :  { %8 = vsyncpa [#allocation5], 0  ;;  %s2326_s9 = smov [#allocation2]   ;;  %s2327_s11 = smov [#allocation4]  }
   0x2   :  { %s15_s10 = sshll.u32 %s2326_s9, 4  ;;  %s25_s12 = sshll.u32 %s2327_s11, 4  ;;  %s16_s10 = int_to_ptr.vmem [resolvable:$true] %s15_s10  ;;  %s26_s12 = int_to_ptr.vmem [resolvable:$true] %s25_s12 }
   0x3   :  { %s2290_s13 = scalar_lea.vmem %s16_s10, 128  ;;  %p2295_p1 = scmp.lt.s32.totalorder %s16_s10, %s16_s10 }
   0x4   :  { %p2291_p0 = scmp.ne.s32.totalorder %s16_s10, %s2290_s13  ;;  %p2296_p2 = scmp.lt.s32.totalorder %s2290_s13, %s2290_s13 }
   0x6   :  { %p2297_p3 = por %p2296_p2, %p2295_p1 }
   0x8   :  { %p2298_p4 = pnand %p2297_p3, %p2291_p0 }
   0xa   :  { %2301 = shalt.err (!%p2298_p4)
}
   0xb   :  { %18 = dma.hbm_to_vmem [thread:$0]  %s3335_s0, 128, %s16_s10, [#allocation3]  }
   0xc   :  { %s2310_s16 = scalar_lea.vmem %s26_s12, 128  ;;  %p2315_p6 = scmp.lt.s32.totalorder %s26_s12, %s26_s12 }
   0xd   :  { %p2311_p5 = scmp.ne.s32.totalorder %s26_s12, %s2310_s16  ;;  %p2316_p7 = scmp.lt.s32.totalorder %s2310_s16, %s2310_s16 }
   0xf   :  { %p2317_p8 = por %p2316_p7, %p2315_p6 }
  0x11   :  { %p2318_p9 = pnand %p2317_p8, %p2311_p5 }
  0x13   :  { %2321 = shalt.err (!%p2318_p9)
}
  0x14   :  { %28 = dma.hbm_to_vmem [thread:$0]  %s3336_s1, 128, %s26_s12, [#allocation5]  }
  0x15   :  { %2322 = dma.done.wait [#allocation3], 128  }
  0x16   :  { %2323 = vsyncadd [#allocation3], 4294967168 }
  0x17   :  { %2324 = dma.done.wait [#allocation5], 128  }
  0x18   :  { %2325 = vsyncadd [#allocation5], 4294967168  ;;  %v37_v0 = vlaneseq  ;;  %v2328_v1 = vmov 0.0   ;;  %v2376_v12 = vld [vmem:[#allocation4] sm:$0xff]  ;;  %v3363_v13 = vmov 0  ;;  %v3345_v16 = vmov 1.0  }
  0x19   :  { %1885 = vmatprep.subr.mxu1 %v2328_v1  ;;  %1850 = vmatprep.subr.mxu0 %v2328_v1  ;;  %v3377_v52 = vmov 0  ;;  %v2331_v32 = vmov 0   ;;  %s2332_s0 = smov 10   ;;  %s2333_s1 = smov 127  }
  0x1a   :  { %v2358_v2 = vand.u32 127, %v37_v0  ;;  %v2360_v3 = vshrl.u32 %v37_v0, 7  ;;  %40 = vadd.xlane.f32.xlu0 %v2376_v12  ;;  %2279 = vset.pattern.permute.xlu1 %v2331_v32  ;;  %s2334_s19 = smov 5  }
  0x1b   :  { %2280 = vset.pattern.permute.xlu0 %v2331_v32 }
  0x1c   :  { %3362 = vst [vmem:[#allocation8_spill] sm:$0xff] %v2358_v2  ;;  %v60_v4 = vadd.s32 120, %v2360_v3  ;;  %v2364_v5 = vadd.s32 10, %v2358_v2  ;;  %v59_v6 = vadd.s32 112, %v2360_v3  ;;  %v58_v7 = vadd.s32 104, %v2360_v3 }
  0x1d   :  { %v57_v8 = vadd.s32 96, %v2360_v3  ;;  %v56_v9 = vadd.s32 88, %v2360_v3  ;;  %v55_v10 = vadd.s32 80, %v2360_v3  ;;  %v54_v11 = vadd.s32 72, %v2360_v3 }
  0x1e   :  { %vm76_vm0 = vcmp.ge.s32.totalorder %v60_v4, %v2358_v2  ;;  %vm93_vm1 = vcmp.lt.s32.totalorder %v60_v4, %v2364_v5  ;;  %vm75_vm2 = vcmp.ge.s32.totalorder %v59_v6, %v2358_v2  ;;  %vm92_vm3 = vcmp.lt.s32.totalorder %v59_v6, %v2364_v5 }
  0x1f   :  { %vm2378_vm4 = vmand %vm76_vm0, %vm93_vm1  ;;  %vm74_vm5 = vcmp.ge.s32.totalorder %v58_v7, %v2358_v2  ;;  %vm91_vm6 = vcmp.lt.s32.totalorder %v58_v7, %v2364_v5  ;;  %vm73_vm7 = vcmp.ge.s32.totalorder %v57_v8, %v2358_v2  ;;  %vm90_vm8 = vcmp.lt.s32.totalorder %v57_v8, %v2364_v5 }
  0x20   :  { %v3364_v13 = vsel %vm2378_vm4, 4294967295, %v3363_v13  ;;  %v1546_v14 = vsel %vm2378_vm4, 1.0, %v2328_v1  ;;  %vm2390_vm9 = vmand %vm75_vm2, %vm92_vm3  ;;  %1851 = vmatpush3.msk.msra.mxu0 %vm2378_vm4, %v3345_v16  ;;  %vm72_vm10 = vcmp.ge.s32.totalorder %v56_v9, %v2358_v2  ;;  %vm89_vm11 = vcmp.lt.s32.totalorder %v56_v9, %v2364_v5 }
  0x21   :  { %vm71_vm12 = vcmp.ge.s32.totalorder %v55_v10, %v2358_v2  ;;  %v2400_v17 = vsub.f32 %v1546_v14, %v1546_v14  ;;  %v1545_v18 = vsel %vm2390_vm9, 1.0, %v2328_v1  ;;  %vm2405_vm13 = vmand %vm74_vm5, %vm91_vm6  ;;  %1852 = vmatprep.subr.mxu0 %v2328_v1  ;;  %vm88_vm14 = vcmp.lt.s32.totalorder %v55_v10, %v2364_v5 }
  0x22   :  { %vm70_vm15 = vcmp.ge.s32.totalorder %v54_v11, %v2358_v2  ;;  %v2412_v20 = vsub.f32 %v1545_v18, %v1545_v18  ;;  %v1544_v21 = vsel %vm2405_vm13, 1.0, %v2328_v1  ;;  %vm2421_vm0 = vmand %vm73_vm7, %vm90_vm8  ;;  %1853 = vmatpush3.msk.msra.mxu0 %vm2390_vm9, %v3345_v16  ;;  %vm87_vm1 = vcmp.lt.s32.totalorder %v54_v11, %v2364_v5 }
  0x23   :  { %v53_v23 = vadd.s32 64, %v2360_v3  ;;  %v2431_v24 = vand.u32 4294901760, %v2400_v17  ;;  %v2433_v25 = vsub.f32 %v1544_v21, %v1544_v21  ;;  %v1543_v26 = vsel %vm2421_vm0, 1.0, %v2328_v1  ;;  %vm2442_vm2 = vmand %vm72_vm10, %vm89_vm11  ;;  %1854 = vmatprep.subr.mxu0 %v2328_v1 }
  0x24   :  { %v52_v28 = vadd.s32 56, %v2360_v3  ;;  %v2449_v29 = vand.u32 4294901760, %v2412_v20  ;;  %v2451_v30 = vsub.f32 %v1543_v26, %v1543_v26  ;;  %v1542_v31 = vsel %vm2442_vm2, 1.0, %v2328_v1  ;;  %vm2460_vm3 = vmand %vm71_vm12, %vm88_vm14  ;;  %1855 = vmatpush3.msk.msra.mxu0 %vm2405_vm13, %v3345_v16 }
  0x25   :  { %vm69_vm5 = vcmp.ge.s32.totalorder %v53_v23, %v2358_v2  ;;  %v237_v33 = vsub.f32 %v2400_v17, %v2431_v24  ;;  %v2471_v34 = vand.u32 4294901760, %v2433_v25  ;;  %v2473_v35 = vsub.f32 %v1542_v31, %v1542_v31  ;;  %vm2482_vm6 = vmand %vm70_vm15, %vm87_vm1  ;;  %1856 = vmatprep.subr.mxu0 %v2328_v1 }
  0x26   :  { %v1541_v36 = vsel %vm2460_vm3, 1.0, %v2328_v1  ;;  %v244_v38 = vsub.f32 %v2412_v20, %v2449_v29  ;;  %v2490_v39 = vand.u32 4294901760, %v2451_v30  ;;  %v1540_v41 = vsel %vm2482_vm6, 1.0, %v2328_v1  ;;  %1857 = vmatpush3.msk.msra.mxu0 %vm2421_vm0, %v3345_v16 }
  0x27   :  { %v2492_v40 = vsub.f32 %v1541_v36, %v1541_v36  ;;  %v2500_v42 = vand.u32 4294901760, %v237_v33  ;;  %v251_v43 = vsub.f32 %v2433_v25, %v2471_v34  ;;  %v2505_v44 = vand.u32 4294901760, %v2473_v35  ;;  %1858 = vmatprep.subr.mxu0 %v2328_v1 }
  0x28   :  { %v2507_v45 = vsub.f32 %v1540_v41, %v1540_v41  ;;  %v2510_v46 = vand.u32 4294901760, %v244_v38  ;;  %v258_v47 = vsub.f32 %v2451_v30, %v2490_v39  ;;  %vm86_vm7 = vcmp.lt.s32.totalorder %v53_v23, %v2364_v5  ;;  %1859 = vmatpush3.msk.msra.mxu0 %vm2442_vm2, %v3345_v16 }
  0x29   :  { %v2515_v48 = vand.u32 4294901760, %v2492_v40  ;;  %1886 = vmatpush3.msra.mxu1 %v2500_v42  ;;  %v2522_v49 = vand.u32 4294901760, %v251_v43  ;;  %v265_v50 = vsub.f32 %v2473_v35, %v2505_v44  ;;  %vm2531_vm8 = vmand %vm69_vm5, %vm86_vm7  ;;  %vm68_vm10 = vcmp.ge.s32.totalorder %v52_v28, %v2358_v2  ;;  %1860 = vmatprep.subr.mxu0 %v2328_v1 }
  0x2a   :  { %v2527_v51 = vand.u32 4294901760, %v2507_v45  ;;  %v3378_v52 = vsel %vm2531_vm8, 4294967295, %v3377_v52  ;;  %1887 = vmatprep.subr.mxu1 %v2328_v1  ;;  %v2538_v53 = vand.u32 4294901760, %v258_v47  ;;  %v1539_v55 = vsel %vm2531_vm8, 1.0, %v2328_v1  ;;  %1861 = vmatpush3.msk.msra.mxu0 %vm2460_vm3, %v3345_v16 }
  0x2b   :  { %v272_v54 = vsub.f32 %v2492_v40, %v2515_v48  ;;  %vm85_vm11 = vcmp.lt.s32.totalorder %v52_v28, %v2364_v5  ;;  %1888 = vmatpush3.msra.mxu1 %v2510_v46  ;;  %v2550_v56 = vand.u32 4294901760, %v265_v50  ;;  %v2554_v58 = vsub.f32 %v1539_v55, %v1539_v55  ;;  %1862 = vmatprep.subr.mxu0 %v2328_v1 }
  0x2c   :  { %v279_v57 = vsub.f32 %v2507_v45, %v2527_v51  ;;  %vm2556_vm12 = vmand %vm68_vm10, %vm85_vm11  ;;  %v51_v60 = vadd.s32 48, %v2360_v3  ;;  %1889 = vmatprep.subr.mxu1 %v2328_v1  ;;  %1863 = vmatpush3.msk.msra.mxu0 %vm2482_vm6, %v3345_v16  ;;  %v50_v63 = vadd.s32 40, %v2360_v3  ;;  %v49_v0 = vadd.s32 32, %v2360_v3 }
  0x2d   :  { %v2563_v61 = vand.u32 4294901760, %v272_v54  ;;  %v1538_v62 = vsel %vm2556_vm12, 1.0, %v2328_v1  ;;  %1890 = vmatpush3.msra.mxu1 %v2522_v49  ;;  %v2577_v6 = vand.u32 4294901760, %v2554_v58  ;;  %1864 = vmatprep.subr.mxu0 %v2328_v1  ;;  %v48_v8 = vadd.s32 24, %v2360_v3 }
  0x2e   :  { %v2574_v4 = vand.u32 4294901760, %v279_v57  ;;  %v2579_v7 = vsub.f32 %v1538_v62, %v1538_v62  ;;  %vm67_vm14 = vcmp.ge.s32.totalorder %v51_v60, %v2358_v2  ;;  %1891 = vmatprep.subr.mxu1 %v2328_v1  ;;  %vm84_vm15 = vcmp.lt.s32.totalorder %v51_v60, %v2364_v5  ;;  %1865 = vmatpush3.msk.msra.mxu0 %vm2531_vm8, %v3345_v16 }
  0x2f   :  { %3381 = vst [vmem:[#allocation9_spill] sm:$0xff] %v2563_v61  ;;  %vm66_vm1 = vcmp.ge.s32.totalorder %v50_v63, %v2358_v2  ;;  %vm83_vm5 = vcmp.lt.s32.totalorder %v50_v63, %v2364_v5  ;;  %1892 = vmatpush3.msra.mxu1 %v2538_v53  ;;  %v286_v9 = vsub.f32 %v2554_v58, %v2577_v6  ;;  %vm2597_vm7 = vmand %vm67_vm14, %vm84_vm15  ;;  %v3385_v18 = vmov 0 }
  0x30   :  { %3382 = vst [vmem:[#allocation10_spill] sm:$0xff] %v2574_v4  ;;  %v2595_v10 = vand.u32 4294901760, %v2579_v7  ;;  %vm65_vm10 = vcmp.ge.s32.totalorder %v49_v0, %v2358_v2  ;;  %vm82_vm11 = vcmp.lt.s32.totalorder %v49_v0, %v2364_v5  ;;  %1866 = vmatprep.subr.mxu0 %v2328_v1  ;;  %1893 = vmatprep.subr.mxu1 %v2328_v1  ;;  %v1537_v14 = vsel %vm2597_vm7, 1.0, %v2328_v1  ;;  %vm2608_vm8 = vmand %vm66_vm1, %vm83_vm5 }
  0x31   :  { %v3386_v18 = vsel %vm2608_vm8, 4294967295, %v3385_v18  ;;  %1867 = vmatpush3.msk.msra.mxu0 %vm2556_vm12, %v3345_v16  ;;  %vm64_vm14 = vcmp.ge.s32.totalorder %v48_v8, %v2358_v2  ;;  %vm81_vm15 = vcmp.lt.s32.totalorder %v48_v8, %v2364_v5  ;;  %v47_v21 = vadd.s32 16, %v2360_v3  ;;  %1894 = vmatpush3.msra.mxu1 %v2550_v56  ;;  %vm2630_vm1 = vmand %vm65_vm10, %vm82_vm11 }
  0x32   :  { %v2619_v23 = vand.u32 4294901760, %v286_v9  ;;  %v293_v26 = vsub.f32 %v2579_v7, %v2595_v10  ;;  %v2623_v28 = vsub.f32 %v1537_v14, %v1537_v14  ;;  %v1536_v31 = vsel %vm2608_vm8, 1.0, %v2328_v1  ;;  %1868 = vmatprep.subr.mxu0 %v2328_v1  ;;  %1895 = vmatprep.subr.mxu1 %v2328_v1  ;;  %vm2641_vm5 = vmand %vm64_vm14, %vm81_vm15 }
  0x33   :  { %v2636_v36 = vsub.f32 %v1536_v31, %v1536_v31  ;;  %v1535_v38 = vsel %vm2630_vm1, 1.0, %v2328_v1  ;;  %1869 = vmatpush3.msk.msra.mxu0 %vm2597_vm7, %v3345_v16  ;;  %vm63_vm10 = vcmp.ge.s32.totalorder %v47_v21, %v2358_v2  ;;  %vm80_vm11 = vcmp.lt.s32.totalorder %v47_v21, %v2364_v5  ;;  %1896 = vmatpush3.msra.mxu1 %v2563_v61 }
  0x34   :  { %3387 = vst [vmem:[#allocation11_spill] sm:$0xff] %v2619_v23  ;;  %v2651_v43 = vand.u32 4294901760, %v293_v26  ;;  %v2654_v47 = vand.u32 4294901760, %v2623_v28  ;;  %v2656_v50 = vsub.f32 %v1535_v38, %v1535_v38  ;;  %v1534_v54 = vsel %vm2641_vm5, 1.0, %v2328_v1  ;;  %vm2661_vm14 = vmand %vm63_vm10, %vm80_vm11  ;;  %1870 = vmatprep.subr.mxu0 %v2328_v1  ;;  %1897 = vmatprep.subr.mxu1 %v2328_v1 }
  0x35   :  { %v2668_v57 = vand.u32 4294901760, %v2636_v36  ;;  %v2670_v60 = vsub.f32 %v1534_v54, %v1534_v54  ;;  %v1533_v62 = vsel %vm2661_vm14, 1.0, %v2328_v1  ;;  %1871 = vmatpush3.msk.msra.mxu0 %vm2608_vm8, %v3345_v16  ;;  %v46_v63 = vadd.s32 8, %v2360_v3  ;;  %1898 = vmatpush3.msra.mxu1 %v2574_v4 }
  0x36   :  { %3392 = vst [vmem:[#allocation12_spill] sm:$0xff] %v2651_v43  ;;  %v300_v0 = vsub.f32 %v2623_v28, %v2654_v47  ;;  %v2683_v8 = vand.u32 4294901760, %v2656_v50  ;;  %v2685_v9 = vsub.f32 %v1533_v62, %v1533_v62  ;;  %1872 = vmatprep.subr.mxu0 %v2328_v1  ;;  %vm2690_vm15 = vcmp.ge.s32.totalorder %v2360_v3, %v2358_v2 }
  0x37   :  { %v3395_v14 = vmov 0  ;;  %1899 = vmatprep.subr.mxu1 %v2328_v1  ;;  %v307_v21 = vsub.f32 %v2636_v36, %v2668_v57  ;;  %v2698_v26 = vand.u32 4294901760, %v2670_v60  ;;  %vm62_vm10 = vcmp.ge.s32.totalorder %v46_v63, %v2358_v2  ;;  %1873 = vmatpush3.msk.msra.mxu0 %vm2630_vm1, %v3345_v16 }
  0x38   :  { %v3396_v14 = vsel %vm2690_vm15, 4294967295, %v3395_v14  ;;  %vm79_vm11 = vcmp.lt.s32.totalorder %v46_v63, %v2364_v5  ;;  %1900 = vmatpush3.msra.mxu1 %v2619_v23  ;;  %v2706_v3 = vand.u32 4294901760, %v300_v0  ;;  %v314_v31 = vsub.f32 %v2656_v50, %v2683_v8  ;;  %1874 = vmatprep.subr.mxu0 %v2328_v1 }
  0x39   :  { %v2711_v38 = vand.u32 4294901760, %v2685_v9  ;;  %vm2713_vm8 = vmand %vm62_vm10, %vm79_vm11  ;;  %v3398_v54 = vmov 0  ;;  %v1531_v5 = vsel %vm2690_vm15, 1.0, %v2328_v1  ;;  %1901 = vmatprep.subr.mxu1 %v2328_v1  ;;  %1875 = vmatpush3.msk.msra.mxu0 %vm2641_vm5, %v3345_v16  ;;  %v2731_v0 = vand.u32 4294901760, %v307_v21 }
  0x3a   :  { %3397 = vst [vmem:[#allocation13_spill] sm:$0xff] %v2706_v3  ;;  %v3399_v54 = vsel %vm2713_vm8, 4294967295, %v3398_v54  ;;  %v1532_v62 = vsel %vm2713_vm8, 1.0, %v2328_v1  ;;  %v2725_v63 = vsub.f32 %v1531_v5, %v1531_v5  ;;  %1902 = vmatpush3.msra.mxu1 %v2651_v43  ;;  %v321_v2 = vsub.f32 %v2670_v60, %v2698_v26  ;;  %1876 = vmatprep.subr.mxu0 %v2328_v1 }
  0x3b   :  { %3400 = vst [vmem:[#allocation14_spill] sm:$0xff] %v2731_v0  ;;  %v2735_v23 = vsub.f32 %v1532_v62, %v1532_v62  ;;  %1903 = vmatprep.subr.mxu1 %v2328_v1  ;;  %vm3354_vm10 = vmmov 0   ;;  %v2742_v5 = vand.u32 4294901760, %v314_v31  ;;  %v328_v21 = vsub.f32 %v2685_v9, %v2711_v38 }
  0x3c   :  { %1917 = vmatprep.mubr.msk.f32.mxu1 %vm3354_vm10, %v2328_v1  ;;  %1904 = vmatpush3.msra.mxu1 %v2706_v3  ;;  %v2750_v62 = vand.u32 4294901760, %v2725_v63  ;;  %v3402_v43 = vmov 1.0   ;;  %v2758_v31 = vand.u32 4294901760, %v321_v2  ;;  %vm3404_vm11 = vnez %v3378_v52 }
  0x3d   :  { %3401 = vst [vmem:[#allocation15_spill] sm:$0xff] %v2742_v5  ;;  %v2747_v16 = vand.u32 4294901760, %v2735_v23  ;;  %1877 = vmatpush3.msk.msra.mxu0 %vm2661_vm14, %v3402_v43  ;;  %1905 = vmatprep.subr.mxu1 %v2328_v1  ;;  %v2768_v4 = vand.u32 4294901760, %v328_v21 }
  0x3e   :  { %1878 = vmatprep.subr.mxu0 %v2328_v1  ;;  %1906 = vmatpush3.msra.mxu1 %v2731_v0  ;;  %3403 = vst [vmem:[#allocation16_spill] sm:$0xff] %v2758_v31  ;;  %v342_v0 = vsub.f32 %v2725_v63, %v2750_v62 }
  0x3f   :  { %v335_v3 = vsub.f32 %v2735_v23, %v2747_v16  ;;  %1879 = vmatpush3.msk.msra.mxu0 %vm2713_vm8, %v3402_v43  ;;  %1907 = vmatprep.subr.mxu1 %v2328_v1 }
  0x40   :  { %1880 = vmatprep.subr.mxu0 %v2328_v1  ;;  %1908 = vmatpush3.msra.mxu1 %v2742_v5  ;;  %v2784_v21 = vand.u32 4294901760, %v342_v0 }
  0x41   :  { %1881 = vmatpush3.msk.msra.mxu0 %vm2690_vm15, %v3402_v43  ;;  %1909 = vmatprep.subr.mxu1 %v2328_v1  ;;  %v2779_v2 = vand.u32 4294901760, %v335_v3 }
  0x42   :  { %1882 = vmatprep.mubr.msk.f32.mxu0 %vm3354_vm10, %v2328_v1  ;;  %1910 = vmatpush3.msra.mxu1 %v2758_v31 }
  0x43   :  { %1920 = vmatprep.subr.mxu0 %v2328_v1  ;;  %1911 = vmatprep.subr.mxu1 %v2328_v1 }
  0x44   :  { %1912 = vmatpush3.msra.mxu1 %v2768_v4 }
  0x45   :  { %1913 = vmatprep.subr.mxu1 %v2328_v1 }
  0x46   :  { %1914 = vmatpush3.msra.mxu1 %v2779_v2 }
  0x47   :  { %1915 = vmatprep.subr.mxu1 %v2328_v1 }
  0x48   :  { %1916 = vmatpush3.msra.mxu1 %v2784_v21 }
  0x49   :  { %1955 = vmatprep.subr.mxu1 %v2328_v1 }
  0xa3   :  { %v41_v3 = vpop.xlane.xlu0 %40 }
  0xa4   :  { %v42_v31 = vmul.f32 0.0078125, %v41_v3 }
  0xa6   :  { %v2792_v5 = vsub.f32 %v2376_v12, %v42_v31 }
  0xa8   :  { %v2795_v61 = vand.u32 4294901760, %v2792_v5 }
  0xaa   :  { %v2799_v0 = vsub.f32 %v2792_v5, %v2795_v61  ;;  %1918 = vmatmul.mubr.f32.vlgmr.msra.gmra.mxu1 %v2795_v61 }
  0xab   :  { %1956 = vmatpush3.msk.msra.mxu1 %vm2378_vm4, %v3402_v43  ;;  %1987 = vmatprep.mubr.msk.f32.mxu1 %vm3354_vm10, %v2328_v1  ;;  %vm3405_vm10 = vnez %v3386_v18 }
  0xac   :  { %1957 = vmatprep.subr.mxu1 %v2328_v1  ;;  %v225_v12 = vand.u32 4294901760, %v2799_v0 }
  0xad   :  { %1958 = vmatpush3.msk.msra.mxu1 %vm2390_vm9, %v3402_v43 }
  0xae   :  { %1959 = vmatprep.subr.mxu1 %v2328_v1  ;;  %v226_v31 = vsub.f32 %v2799_v0, %v225_v12 }
  0xaf   :  { %1960 = vmatpush3.msk.msra.mxu1 %vm2405_vm13, %v3402_v43 }
  0xb0   :  { %1961 = vmatprep.subr.mxu1 %v2328_v1  ;;  %v227_v3 = vand.u32 4294901760, %v226_v31  ;;  %v3415_v31 = vld [vmem:[#allocation16_spill] sm:$0xff] }
  0xb1   :  { %1962 = vmatpush3.msk.msra.mxu1 %vm2421_vm0, %v3402_v43 }
  0xb2   :  { %1963 = vmatprep.subr.mxu1 %v2328_v1  ;;  %1883 = vmatmul.mubr.f32.vlgmr.msra.gmra.mxu0 %v227_v3 }
  0xb3   :  { %1921 = vmatpush3.msra.mxu0 %v2400_v17  ;;  %1964 = vmatpush3.msk.msra.mxu1 %vm2442_vm2, %v3402_v43 }
  0xb4   :  { %1922 = vmatprep.subr.mxu0 %v2328_v1  ;;  %1965 = vmatprep.subr.mxu1 %v2328_v1 }
  0xb5   :  { %1923 = vmatpush3.msra.mxu0 %v2412_v20  ;;  %1966 = vmatpush3.msk.msra.mxu1 %vm2460_vm3, %v3402_v43 }
  0xb6   :  { %1924 = vmatprep.subr.mxu0 %v2328_v1  ;;  %1967 = vmatprep.subr.mxu1 %v2328_v1 }
  0xb7   :  { %1925 = vmatpush3.msra.mxu0 %v2433_v25  ;;  %1968 = vmatpush3.msk.msra.mxu1 %vm2482_vm6, %v3402_v43 }
  0xb8   :  { %1926 = vmatprep.subr.mxu0 %v2328_v1  ;;  %1969 = vmatprep.subr.mxu1 %v2328_v1 }
  0xb9   :  { %1927 = vmatpush3.msra.mxu0 %v2451_v30  ;;  %1970 = vmatpush3.msk.msra.mxu1 %vm3404_vm11, %v3402_v43 }
  0xba   :  { %1928 = vmatprep.subr.mxu0 %v2328_v1  ;;  %1971 = vmatprep.subr.mxu1 %v2328_v1 }
  0xbb   :  { %1929 = vmatpush3.msra.mxu0 %v2473_v35  ;;  %1972 = vmatpush3.msk.msra.mxu1 %vm2556_vm12, %v3402_v43 }
  0xbc   :  { %1930 = vmatprep.subr.mxu0 %v2328_v1  ;;  %1973 = vmatprep.subr.mxu1 %v2328_v1 }
  0xbd   :  { %1931 = vmatpush3.msra.mxu0 %v2492_v40  ;;  %1974 = vmatpush3.msk.msra.mxu1 %vm2597_vm7, %v3402_v43 }
  0xbe   :  { %1932 = vmatprep.subr.mxu0 %v2328_v1  ;;  %1975 = vmatprep.subr.mxu1 %v2328_v1 }
  0xbf   :  { %1933 = vmatpush3.msra.mxu0 %v2507_v45  ;;  %1976 = vmatpush3.msk.msra.mxu1 %vm3405_vm10, %v3402_v43 }
  0xc0   :  { %1934 = vmatprep.subr.mxu0 %v2328_v1  ;;  %1977 = vmatprep.subr.mxu1 %v2328_v1 }
  0xc1   :  { %1935 = vmatpush3.msra.mxu0 %v2554_v58  ;;  %1978 = vmatpush3.msk.msra.mxu1 %vm2630_vm1, %v3402_v43 }
  0xc2   :  { %1936 = vmatprep.subr.mxu0 %v2328_v1  ;;  %1979 = vmatprep.subr.mxu1 %v2328_v1 }
  0xc3   :  { %1937 = vmatpush3.msra.mxu0 %v2579_v7  ;;  %1980 = vmatpush3.msk.msra.mxu1 %vm2641_vm5, %v3402_v43 }
  0xc4   :  { %1938 = vmatprep.subr.mxu0 %v2328_v1  ;;  %1981 = vmatprep.subr.mxu1 %v2328_v1 }
  0xc5   :  { %1939 = vmatpush3.msra.mxu0 %v2623_v28  ;;  %1982 = vmatpush3.msk.msra.mxu1 %vm2661_vm14, %v3402_v43 }
  0xc6   :  { %1940 = vmatprep.subr.mxu0 %v2328_v1  ;;  %1983 = vmatprep.subr.mxu1 %v2328_v1 }
  0xc7   :  { %1941 = vmatpush3.msra.mxu0 %v2636_v36  ;;  %1984 = vmatpush3.msk.msra.mxu1 %vm2713_vm8, %v3402_v43 }
  0xc8   :  { %1942 = vmatprep.subr.mxu0 %v2328_v1  ;;  %1985 = vmatprep.subr.mxu1 %v2328_v1 }
  0xc9   :  { %1943 = vmatpush3.msra.mxu0 %v2656_v50  ;;  %1986 = vmatpush3.msk.msra.mxu1 %vm2690_vm15, %v3402_v43 }
  0xca   :  { %1944 = vmatprep.subr.mxu0 %v2328_v1  ;;  %1988 = vmatmul.mubr.f32.vlgmr.msra.gmra.mxu1 %v225_v12 }
  0xcb   :  { %2025 = vmatprep.subr.mxu1 %v2328_v1  ;;  %1945 = vmatpush3.msra.mxu0 %v2670_v60 }
  0xcc   :  { %2026 = vmatpush3.msk.msra.mxu1 %vm2378_vm4, %v3402_v43  ;;  %1946 = vmatprep.subr.mxu0 %v2328_v1  ;;  %vm3406_vm4 = vmmov 0  }
  0xcd   :  { %2027 = vmatprep.subr.mxu1 %v2328_v1  ;;  %1947 = vmatpush3.msra.mxu0 %v2685_v9 }
  0xce   :  { %2028 = vmatpush3.msk.msra.mxu1 %vm2390_vm9, %v3402_v43  ;;  %1948 = vmatprep.subr.mxu0 %v2328_v1 }
  0xcf   :  { %2029 = vmatprep.subr.mxu1 %v2328_v1  ;;  %1949 = vmatpush3.msra.mxu0 %v2735_v23 }
  0xd0   :  { %2030 = vmatpush3.msk.msra.mxu1 %vm2405_vm13, %v3402_v43  ;;  %1950 = vmatprep.subr.mxu0 %v2328_v1 }
  0xd1   :  { %2031 = vmatprep.subr.mxu1 %v2328_v1  ;;  %1951 = vmatpush3.msra.mxu0 %v2725_v63 }
  0xd2   :  { %1952 = vmatprep.mubr.msk.f32.mxu0 %vm3406_vm4, %v2328_v1  ;;  %2032 = vmatpush3.msk.msra.mxu1 %vm2421_vm0, %v3402_v43 }
  0xd3   :  { %1953 = vmatmul.mubr.f32.vlgmr.msra.gmra.mxu0 %v2799_v0  ;;  %1990 = vmatprep.subr.mxu0 %v2328_v1  ;;  %v3413_v0 = vld [vmem:[#allocation14_spill] sm:$0xff] }
  0xd4   :  { %2033 = vmatprep.subr.mxu1 %v2328_v1  ;;  %1991 = vmatpush3.msra.mxu0 %v2431_v24 }
  0xd5   :  { %2034 = vmatpush3.msk.msra.mxu1 %vm2442_vm2, %v3402_v43  ;;  %1992 = vmatprep.subr.mxu0 %v2328_v1 }
  0xd6   :  { %2035 = vmatprep.subr.mxu1 %v2328_v1  ;;  %1993 = vmatpush3.msra.mxu0 %v2449_v29 }
  0xd7   :  { %2036 = vmatpush3.msk.msra.mxu1 %vm2460_vm3, %v3402_v43  ;;  %1994 = vmatprep.subr.mxu0 %v2328_v1 }
  0xd8   :  { %2037 = vmatprep.subr.mxu1 %v2328_v1  ;;  %1995 = vmatpush3.msra.mxu0 %v2471_v34 }
  0xd9   :  { %2038 = vmatpush3.msk.msra.mxu1 %vm2482_vm6, %v3402_v43  ;;  %1996 = vmatprep.subr.mxu0 %v2328_v1 }
  0xda   :  { %2039 = vmatprep.subr.mxu1 %v2328_v1  ;;  %1997 = vmatpush3.msra.mxu0 %v2490_v39 }
  0xdb   :  { %2040 = vmatpush3.msk.msra.mxu1 %vm3404_vm11, %v3402_v43  ;;  %1998 = vmatprep.subr.mxu0 %v2328_v1 }
  0xdc   :  { %2041 = vmatprep.subr.mxu1 %v2328_v1  ;;  %1999 = vmatpush3.msra.mxu0 %v2505_v44 }
  0xdd   :  { %2042 = vmatpush3.msk.msra.mxu1 %vm2556_vm12, %v3402_v43  ;;  %2000 = vmatprep.subr.mxu0 %v2328_v1 }
  0xde   :  { %2043 = vmatprep.subr.mxu1 %v2328_v1  ;;  %2001 = vmatpush3.msra.mxu0 %v2515_v48 }
  0xdf   :  { %2044 = vmatpush3.msk.msra.mxu1 %vm2597_vm7, %v3402_v43  ;;  %2002 = vmatprep.subr.mxu0 %v2328_v1 }
  0xe0   :  { %2045 = vmatprep.subr.mxu1 %v2328_v1  ;;  %2003 = vmatpush3.msra.mxu0 %v2527_v51 }
  0xe1   :  { %2046 = vmatpush3.msk.msra.mxu1 %vm3405_vm10, %v3402_v43  ;;  %2004 = vmatprep.subr.mxu0 %v2328_v1 }
  0xe2   :  { %2047 = vmatprep.subr.mxu1 %v2328_v1  ;;  %2005 = vmatpush3.msra.mxu0 %v2577_v6 }
  0xe3   :  { %2048 = vmatpush3.msk.msra.mxu1 %vm2630_vm1, %v3402_v43  ;;  %2006 = vmatprep.subr.mxu0 %v2328_v1 }
  0xe4   :  { %2049 = vmatprep.subr.mxu1 %v2328_v1  ;;  %2007 = vmatpush3.msra.mxu0 %v2595_v10 }
  0xe5   :  { %2050 = vmatpush3.msk.msra.mxu1 %vm2641_vm5, %v3402_v43  ;;  %2008 = vmatprep.subr.mxu0 %v2328_v1 }
  0xe6   :  { %2051 = vmatprep.subr.mxu1 %v2328_v1  ;;  %2009 = vmatpush3.msra.mxu0 %v2654_v47 }
  0xe7   :  { %2052 = vmatpush3.msk.msra.mxu1 %vm2661_vm14, %v3402_v43  ;;  %2010 = vmatprep.subr.mxu0 %v2328_v1 }
  0xe8   :  { %2053 = vmatprep.subr.mxu1 %v2328_v1  ;;  %2011 = vmatpush3.msra.mxu0 %v2668_v57 }
  0xe9   :  { %2054 = vmatpush3.msk.msra.mxu1 %vm2713_vm8, %v3402_v43  ;;  %2012 = vmatprep.subr.mxu0 %v2328_v1 }
  0xea   :  { %2055 = vmatprep.subr.mxu1 %v2328_v1  ;;  %2013 = vmatpush3.msra.mxu0 %v2683_v8 }
  0xeb   :  { %2056 = vmatpush3.msk.msra.mxu1 %vm2690_vm15, %v3402_v43  ;;  %2057 = vmatprep.mubr.msk.f32.mxu1 %vm3406_vm4, %v2328_v1  ;;  %vm3407_vm15 = vnez %v3364_v13 }
  0xec   :  { %2014 = vmatprep.subr.mxu0 %v2328_v1  ;;  %2058 = vmatmul.mubr.f32.vlgmr.msra.gmra.mxu1 %v2795_v61 }
  0xed   :  { %2095 = vmatprep.subr.mxu1 %v2328_v1  ;;  %2015 = vmatpush3.msra.mxu0 %v2698_v26 }
  0xee   :  { %2096 = vmatpush3.msra.mxu1 %v2500_v42  ;;  %2016 = vmatprep.subr.mxu0 %v2328_v1  ;;  %v3408_v42 = vld [vmem:[#allocation9_spill] sm:$0xff] }
  0xef   :  { %2097 = vmatprep.subr.mxu1 %v2328_v1  ;;  %2017 = vmatpush3.msra.mxu0 %v2711_v38 }
  0xf0   :  { %2098 = vmatpush3.msra.mxu1 %v2510_v46  ;;  %2018 = vmatprep.subr.mxu0 %v2328_v1  ;;  %v3409_v46 = vld [vmem:[#allocation10_spill] sm:$0xff] }
  0xf1   :  { %2099 = vmatprep.subr.mxu1 %v2328_v1  ;;  %2019 = vmatpush3.msra.mxu0 %v2747_v16 }
  0xf2   :  { %2100 = vmatpush3.msra.mxu1 %v2522_v49  ;;  %2020 = vmatprep.subr.mxu0 %v2328_v1  ;;  %v3410_v49 = vld [vmem:[#allocation11_spill] sm:$0xff] }
  0xf3   :  { %2101 = vmatprep.subr.mxu1 %v2328_v1  ;;  %2021 = vmatpush3.msra.mxu0 %v2750_v62 }
  0xf4   :  { %2022 = vmatprep.mubr.msk.f32.mxu0 %vm3406_vm4, %v2328_v1  ;;  %2102 = vmatpush3.msra.mxu1 %v2538_v53  ;;  %v3411_v53 = vld [vmem:[#allocation12_spill] sm:$0xff] }
  0xf5   :  { %2023 = vmatmul.mubr.f32.vlgmr.msra.gmra.mxu0 %v2795_v61  ;;  %2060 = vmatprep.subr.mxu0 %v2328_v1  ;;  %v3412_v61 = vld [vmem:[#allocation13_spill] sm:$0xff] }
  0xf6   :  { %2103 = vmatprep.subr.mxu1 %v2328_v1  ;;  %2061 = vmatpush3.msk.msra.mxu0 %vm3407_vm15, %v3402_v43 }
  0xf7   :  { %2104 = vmatpush3.msra.mxu1 %v2550_v56  ;;  %2062 = vmatprep.subr.mxu0 %v2328_v1  ;;  %v783_v56 = vmul.f32 %v2792_v5, %v2792_v5  ;;  %v3414_v5 = vld [vmem:[#allocation15_spill] sm:$0xff] }
  0xf8   :  { %2105 = vmatprep.subr.mxu1 %v2328_v1  ;;  %2063 = vmatpush3.msk.msra.mxu0 %vm2390_vm9, %v3402_v43 }
  0xf9   :  { %2106 = vmatpush3.msra.mxu1 %v3408_v42  ;;  %2064 = vmatprep.subr.mxu0 %v2328_v1  ;;  %v3064_v12 = vand.u32 4294901760, %v783_v56 }
  0xfa   :  { %2107 = vmatprep.subr.mxu1 %v2328_v1  ;;  %2065 = vmatpush3.msk.msra.mxu0 %vm2405_vm13, %v3402_v43 }
  0xfb   :  { %2108 = vmatpush3.msra.mxu1 %v3409_v46  ;;  %2066 = vmatprep.subr.mxu0 %v2328_v1  ;;  %v3079_v3 = vsub.f32 %v783_v56, %v3064_v12 }
  0xfc   :  { %2109 = vmatprep.subr.mxu1 %v2328_v1  ;;  %2067 = vmatpush3.msk.msra.mxu0 %vm2421_vm0, %v3402_v43 }
  0xfd   :  { %2110 = vmatpush3.msra.mxu1 %v3410_v49  ;;  %2068 = vmatprep.subr.mxu0 %v2328_v1 }
  0xfe   :  { %2111 = vmatprep.subr.mxu1 %v2328_v1  ;;  %2069 = vmatpush3.msk.msra.mxu0 %vm2442_vm2, %v3402_v43 }
  0xff   :  { %2112 = vmatpush3.msra.mxu1 %v3411_v53  ;;  %2070 = vmatprep.subr.mxu0 %v2328_v1 }
 0x100   :  { %2113 = vmatprep.subr.mxu1 %v2328_v1  ;;  %2071 = vmatpush3.msk.msra.mxu0 %vm2460_vm3, %v3402_v43 }
 0x101   :  { %2114 = vmatpush3.msra.mxu1 %v3412_v61  ;;  %2072 = vmatprep.subr.mxu0 %v2328_v1 }
 0x102   :  { %2115 = vmatprep.subr.mxu1 %v2328_v1  ;;  %2073 = vmatpush3.msk.msra.mxu0 %vm2482_vm6, %v3402_v43 }
 0x103   :  { %2116 = vmatpush3.msra.mxu1 %v3413_v0  ;;  %2074 = vmatprep.subr.mxu0 %v2328_v1 }
 0x104   :  { %2117 = vmatprep.subr.mxu1 %v2328_v1  ;;  %2075 = vmatpush3.msk.msra.mxu0 %vm3404_vm11, %v3402_v43 }
 0x105   :  { %2118 = vmatpush3.msra.mxu1 %v3414_v5  ;;  %2076 = vmatprep.subr.mxu0 %v2328_v1 }
 0x106   :  { %2119 = vmatprep.subr.mxu1 %v2328_v1  ;;  %2077 = vmatpush3.msk.msra.mxu0 %vm2556_vm12, %v3402_v43 }
 0x107   :  { %2120 = vmatpush3.msra.mxu1 %v3415_v31  ;;  %2078 = vmatprep.subr.mxu0 %v2328_v1 }
 0x108   :  { %2121 = vmatprep.subr.mxu1 %v2328_v1  ;;  %2079 = vmatpush3.msk.msra.mxu0 %vm2597_vm7, %v3402_v43 }
 0x109   :  { %2122 = vmatpush3.msra.mxu1 %v2768_v4  ;;  %2080 = vmatprep.subr.mxu0 %v2328_v1  ;;  %v867_v4 = vand.u32 4294901760, %v3079_v3 }
 0x10a   :  { %2123 = vmatprep.subr.mxu1 %v2328_v1  ;;  %2081 = vmatpush3.msk.msra.mxu0 %vm3405_vm10, %v3402_v43 }
 0x10b   :  { %2124 = vmatpush3.msra.mxu1 %v2779_v2  ;;  %2082 = vmatprep.subr.mxu0 %v2328_v1  ;;  %v868_v2 = vsub.f32 %v3079_v3, %v867_v4 }
 0x10c   :  { %2125 = vmatprep.subr.mxu1 %v2328_v1  ;;  %2083 = vmatpush3.msk.msra.mxu0 %vm2630_vm1, %v3402_v43 }
 0x10d   :  { %2126 = vmatpush3.msra.mxu1 %v2784_v21  ;;  %2127 = vmatprep.mubr.msk.f32.mxu1 %vm3406_vm4, %v2328_v1  ;;  %v869_v21 = vand.u32 4294901760, %v868_v2 }
 0x10e   :  { %2084 = vmatprep.subr.mxu0 %v2328_v1  ;;  %2128 = vmatmul.mubr.f32.vlgmr.msra.gmra.mxu1 %v3064_v12 }
 0x10f   :  { %2165 = vmatprep.subr.mxu1 %v2328_v1  ;;  %2085 = vmatpush3.msk.msra.mxu0 %vm2641_vm5, %v3402_v43 }
 0x110   :  { %2166 = vmatpush3.msk.msra.mxu1 %vm3407_vm15, %v3402_v43  ;;  %2086 = vmatprep.subr.mxu0 %v2328_v1  ;;  %vm3416_vm15 = vnez %v3396_v14 }
 0x111   :  { %2167 = vmatprep.subr.mxu1 %v2328_v1  ;;  %2087 = vmatpush3.msk.msra.mxu0 %vm2661_vm14, %v3402_v43 }
 0x112   :  { %2168 = vmatpush3.msk.msra.mxu1 %vm2390_vm9, %v3402_v43  ;;  %2088 = vmatprep.subr.mxu0 %v2328_v1 }
 0x113   :  { %2169 = vmatprep.subr.mxu1 %v2328_v1  ;;  %2089 = vmatpush3.msk.msra.mxu0 %vm2713_vm8, %v3402_v43 }
 0x114   :  { %2170 = vmatpush3.msk.msra.mxu1 %vm2405_vm13, %v3402_v43  ;;  %2090 = vmatprep.subr.mxu0 %v2328_v1 }
 0x115   :  { %2171 = vmatprep.subr.mxu1 %v2328_v1  ;;  %2091 = vmatpush3.msk.msra.mxu0 %vm3416_vm15, %v3402_v43 }
 0x116   :  { %2092 = vmatprep.mubr.msk.f32.mxu0 %vm3406_vm4, %v2328_v1  ;;  %2172 = vmatpush3.msk.msra.mxu1 %vm2421_vm0, %v3402_v43 }
 0x117   :  { %2093 = vmatmul.mubr.f32.vlgmr.msra.gmra.mxu0 %v869_v21  ;;  %2130 = vmatprep.subr.mxu0 %v2328_v1 }
 0x118   :  { %2173 = vmatprep.subr.mxu1 %v2328_v1  ;;  %2131 = vmatpush3.msra.mxu0 %v2400_v17 }
 0x119   :  { %2174 = vmatpush3.msk.msra.mxu1 %vm2442_vm2, %v3402_v43  ;;  %2132 = vmatprep.subr.mxu0 %v2328_v1 }
 0x11a   :  { %2175 = vmatprep.subr.mxu1 %v2328_v1  ;;  %2133 = vmatpush3.msra.mxu0 %v2412_v20 }
 0x11b   :  { %2176 = vmatpush3.msk.msra.mxu1 %vm2460_vm3, %v3402_v43  ;;  %2134 = vmatprep.subr.mxu0 %v2328_v1 }
 0x11c   :  { %2177 = vmatprep.subr.mxu1 %v2328_v1  ;;  %2135 = vmatpush3.msra.mxu0 %v2433_v25 }
 0x11d   :  { %2178 = vmatpush3.msk.msra.mxu1 %vm2482_vm6, %v3402_v43  ;;  %2136 = vmatprep.subr.mxu0 %v2328_v1 }
 0x11e   :  { %2179 = vmatprep.subr.mxu1 %v2328_v1  ;;  %2137 = vmatpush3.msra.mxu0 %v2451_v30 }
 0x11f   :  { %2180 = vmatpush3.msk.msra.mxu1 %vm3404_vm11, %v3402_v43  ;;  %2138 = vmatprep.subr.mxu0 %v2328_v1 }
 0x120   :  { %2181 = vmatprep.subr.mxu1 %v2328_v1  ;;  %2139 = vmatpush3.msra.mxu0 %v2473_v35 }
 0x121   :  { %2182 = vmatpush3.msk.msra.mxu1 %vm2556_vm12, %v3402_v43  ;;  %2140 = vmatprep.subr.mxu0 %v2328_v1 }
 0x122   :  { %2183 = vmatprep.subr.mxu1 %v2328_v1  ;;  %2141 = vmatpush3.msra.mxu0 %v2492_v40 }
 0x123   :  { %2184 = vmatpush3.msk.msra.mxu1 %vm2597_vm7, %v3402_v43  ;;  %2142 = vmatprep.subr.mxu0 %v2328_v1 }
 0x124   :  { %2185 = vmatprep.subr.mxu1 %v2328_v1  ;;  %2143 = vmatpush3.msra.mxu0 %v2507_v45 }
 0x125   :  { %2186 = vmatpush3.msk.msra.mxu1 %vm3405_vm10, %v3402_v43  ;;  %2144 = vmatprep.subr.mxu0 %v2328_v1 }
 0x126   :  { %2187 = vmatprep.subr.mxu1 %v2328_v1  ;;  %2145 = vmatpush3.msra.mxu0 %v2554_v58 }
 0x127   :  { %2188 = vmatpush3.msk.msra.mxu1 %vm2630_vm1, %v3402_v43  ;;  %2146 = vmatprep.subr.mxu0 %v2328_v1 }
 0x128   :  { %2189 = vmatprep.subr.mxu1 %v2328_v1  ;;  %2147 = vmatpush3.msra.mxu0 %v2579_v7 }
 0x129   :  { %2190 = vmatpush3.msk.msra.mxu1 %vm2641_vm5, %v3402_v43  ;;  %2148 = vmatprep.subr.mxu0 %v2328_v1 }
 0x12a   :  { %2191 = vmatprep.subr.mxu1 %v2328_v1  ;;  %2149 = vmatpush3.msra.mxu0 %v2623_v28 }
 0x12b   :  { %2192 = vmatpush3.msk.msra.mxu1 %vm2661_vm14, %v3402_v43  ;;  %2150 = vmatprep.subr.mxu0 %v2328_v1 }
 0x12c   :  { %2193 = vmatprep.subr.mxu1 %v2328_v1  ;;  %2151 = vmatpush3.msra.mxu0 %v2636_v36 }
 0x12d   :  { %2194 = vmatpush3.msk.msra.mxu1 %vm2713_vm8, %v3402_v43  ;;  %2152 = vmatprep.subr.mxu0 %v2328_v1  ;;  %vm3417_vm8 = vnez %v3364_v13 }
 0x12e   :  { %2195 = vmatprep.subr.mxu1 %v2328_v1  ;;  %2153 = vmatpush3.msra.mxu0 %v2656_v50 }
 0x12f   :  { %2196 = vmatpush3.msk.msra.mxu1 %vm3416_vm15, %v3402_v43  ;;  %2197 = vmatprep.mubr.msk.f32.mxu1 %vm3406_vm4, %v2328_v1 }
 0x130   :  { %2154 = vmatprep.subr.mxu0 %v2328_v1  ;;  %2198 = vmatmul.mubr.f32.vlgmr.msra.gmra.mxu1 %v867_v4 }
 0x131   :  { %2235 = vmatprep.subr.mxu1 %v2328_v1  ;;  %2155 = vmatpush3.msra.mxu0 %v2670_v60  ;;  %v35_v60 = vld [vmem:[#allocation2] sm:$0xff] }
 0x132   :  { %2236 = vmatpush3.msk.msra.mxu1 %vm3417_vm8, %v3402_v43  ;;  %2156 = vmatprep.subr.mxu0 %v2328_v1 }
 0x133   :  { %2237 = vmatprep.subr.mxu1 %v2328_v1  ;;  %2157 = vmatpush3.msra.mxu0 %v2685_v9 }
 0x134   :  { %2238 = vmatpush3.msk.msra.mxu1 %vm2390_vm9, %v3402_v43  ;;  %2158 = vmatprep.subr.mxu0 %v2328_v1  ;;  %vm3418_vm9 = vnez %v3399_v54 }
 0x135   :  { %2239 = vmatprep.subr.mxu1 %v2328_v1  ;;  %2159 = vmatpush3.msra.mxu0 %v2735_v23 }
 0x136   :  { %2240 = vmatpush3.msk.msra.mxu1 %vm2405_vm13, %v3402_v43  ;;  %2160 = vmatprep.subr.mxu0 %v2328_v1 }
 0x137   :  { %2241 = vmatprep.subr.mxu1 %v2328_v1  ;;  %2161 = vmatpush3.msra.mxu0 %v2725_v63 }
 0x138   :  { %2162 = vmatprep.mubr.msk.f32.mxu0 %vm3406_vm4, %v2328_v1  ;;  %2242 = vmatpush3.msk.msra.mxu1 %vm2421_vm0, %v3402_v43 }
 0x139   :  { %2163 = vmatmul.mubr.f32.vlgmr.msra.gmra.mxu0 %v3079_v3  ;;  %2200 = vmatprep.subr.mxu0 %v2328_v1 }
 0x13a   :  { %2243 = vmatprep.subr.mxu1 %v2328_v1  ;;  %2201 = vmatpush3.msra.mxu0 %v2431_v24 }
 0x13b   :  { %2244 = vmatpush3.msk.msra.mxu1 %vm2442_vm2, %v3402_v43  ;;  %2202 = vmatprep.subr.mxu0 %v2328_v1 }
 0x13c   :  { %2245 = vmatprep.subr.mxu1 %v2328_v1  ;;  %2203 = vmatpush3.msra.mxu0 %v2449_v29 }
 0x13d   :  { %2246 = vmatpush3.msk.msra.mxu1 %vm2460_vm3, %v3402_v43  ;;  %2204 = vmatprep.subr.mxu0 %v2328_v1 }
 0x13e   :  { %2247 = vmatprep.subr.mxu1 %v2328_v1  ;;  %2205 = vmatpush3.msra.mxu0 %v2471_v34 }
 0x13f   :  { %2248 = vmatpush3.msk.msra.mxu1 %vm2482_vm6, %v3402_v43  ;;  %2206 = vmatprep.subr.mxu0 %v2328_v1 }
 0x140   :  { %2249 = vmatprep.subr.mxu1 %v2328_v1  ;;  %2207 = vmatpush3.msra.mxu0 %v2490_v39 }
 0x141   :  { %2250 = vmatpush3.msk.msra.mxu1 %vm3404_vm11, %v3402_v43  ;;  %2208 = vmatprep.subr.mxu0 %v2328_v1 }
 0x142   :  { %2251 = vmatprep.subr.mxu1 %v2328_v1  ;;  %2209 = vmatpush3.msra.mxu0 %v2505_v44 }
 0x143   :  { %2252 = vmatpush3.msk.msra.mxu1 %vm2556_vm12, %v3402_v43  ;;  %2210 = vmatprep.subr.mxu0 %v2328_v1 }
 0x144   :  { %2253 = vmatprep.subr.mxu1 %v2328_v1  ;;  %2211 = vmatpush3.msra.mxu0 %v2515_v48 }
 0x145   :  { %2254 = vmatpush3.msk.msra.mxu1 %vm2597_vm7, %v3402_v43  ;;  %2212 = vmatprep.subr.mxu0 %v2328_v1 }
 0x146   :  { %2255 = vmatprep.subr.mxu1 %v2328_v1  ;;  %2213 = vmatpush3.msra.mxu0 %v2527_v51 }
 0x147   :  { %2256 = vmatpush3.msk.msra.mxu1 %vm3405_vm10, %v3402_v43  ;;  %2214 = vmatprep.subr.mxu0 %v2328_v1 }
 0x148   :  { %2257 = vmatprep.subr.mxu1 %v2328_v1  ;;  %2215 = vmatpush3.msra.mxu0 %v2577_v6 }
 0x149   :  { %2258 = vmatpush3.msk.msra.mxu1 %vm2630_vm1, %v3402_v43  ;;  %2216 = vmatprep.subr.mxu0 %v2328_v1 }
 0x14a   :  { %2259 = vmatprep.subr.mxu1 %v2328_v1  ;;  %2217 = vmatpush3.msra.mxu0 %v2595_v10 }
 0x14b   :  { %2260 = vmatpush3.msk.msra.mxu1 %vm2641_vm5, %v3402_v43  ;;  %2218 = vmatprep.subr.mxu0 %v2328_v1 }
 0x14c   :  { %2261 = vmatprep.subr.mxu1 %v2328_v1  ;;  %2219 = vmatpush3.msra.mxu0 %v2654_v47 }
 0x14d   :  { %2262 = vmatpush3.msk.msra.mxu1 %vm2661_vm14, %v3402_v43  ;;  %2220 = vmatprep.subr.mxu0 %v2328_v1 }
 0x14e   :  { %2263 = vmatprep.subr.mxu1 %v2328_v1  ;;  %2221 = vmatpush3.msra.mxu0 %v2668_v57 }
 0x14f   :  { %2264 = vmatpush3.msk.msra.mxu1 %vm3418_vm9, %v3402_v43  ;;  %2222 = vmatprep.subr.mxu0 %v2328_v1 }
 0x150   :  { %2265 = vmatprep.subr.mxu1 %v2328_v1  ;;  %2223 = vmatpush3.msra.mxu0 %v2683_v8  ;;  %v2281_v8 = vld [vmem:[#allocation4] sm:$0xff] }
 0x151   :  { %2266 = vmatpush3.msk.msra.mxu1 %vm3416_vm15, %v3402_v43  ;;  %2267 = vmatprep.mubr.msk.f32.mxu1 %vm3406_vm4, %v2328_v1  ;;  %v39_v2 = vsub.f32 %v35_v60, %v2281_v8 }
 0x152   :  { %2224 = vmatprep.subr.mxu0 %v2328_v1  ;;  %2268 = vmatmul.mubr.f32.vlgmr.msra.gmra.mxu1 %v3064_v12 }
 0x153   :  { %2225 = vmatpush3.msra.mxu0 %v2698_v26  ;;  %2232 = vmatprep.mubr.msk.f32.mxu0 %vm3406_vm4, %v2328_v1  ;;  %v3419_v26 = vld [vmem:[#allocation8_spill] sm:$0xff] }
 0x154   :  { %2226 = vmatprep.subr.mxu0 %v2328_v1  ;;  %vm1444_vm4 = vcmp.ge.s32.totalorder %v3419_v26, 124  ;;  %vm1443_vm13 = vcmp.lt.s32.totalorder %v3419_v26, 5  ;;  %vm1460_vm2 = vcmp.lt.s32.totalorder %v3419_v26, 127  ;;  %vm1497_vm3 = vcmp.lt.s32.totalorder %v3419_v26, 126 }
 0x155   :  { %2227 = vmatpush3.msra.mxu0 %v2711_v38  ;;  %v1644_v31 = vsel %vm1460_vm2, 1.0, %v2328_v1  ;;  %vm1518_vm6 = vcmp.eq.s32.totalorder %v3419_v26, 1  ;;  %vm1516_vm8 = vcmp.eq.s32.totalorder %v3419_v26, 0  ;;  %vm1521_vm12 = vcmp.eq.s32.totalorder %v3419_v26, 2 }
 0x156   :  { %2228 = vmatprep.subr.mxu0 %v2328_v1 }
 0x157   :  { %2229 = vmatpush3.msra.mxu0 %v2747_v16 }
 0x158   :  { %2230 = vmatprep.subr.mxu0 %v2328_v1 }
 0x159   :  { %2231 = vmatpush3.msra.mxu0 %v2750_v62 }
 0x15a   :  { %2233 = vmatmul.mubr.f32.vlgmr.msra.gmra.mxu0 %v3064_v12 }
 0x16a   :  { %v380_v13 = vpop.f32.mrf.mxu1 }
 0x16c   :  { %v1919_v15 = vpop.f32.mrf.mxu1 }
 0x172   :  { %v229_v17 = vpop.f32.mrf.mxu0 }
 0x173   :  { %v381_v19 = vadd.f32 %v380_v13, %v229_v17 }
 0x174   :  { %v1884_v20 = vpop.f32.mrf.mxu0 }
 0x18a   :  { %v573_v22 = vpop.f32.mrf.mxu1 }
 0x18c   :  { %v1989_v24 = vpop.f32.mrf.mxu1 }
 0x193   :  { %v484_v25 = vpop.f32.mrf.mxu0 }
 0x194   :  { %v485_v27 = vadd.f32 %v484_v25, %v381_v19  ;;  %v1476_v19 = vmul.f32 %v39_v2, %v39_v2 }
 0x195   :  { %v1954_v29 = vpop.f32.mrf.mxu0 }
 0x196   :  { %v574_v30 = vadd.f32 %v573_v22, %v485_v27  ;;  %v1645_v27 = vsel %vm1497_vm3, 1.0, %v2328_v1 }
 0x1ac   :  { %v779_v16 = vpop.f32.mrf.mxu1 }
 0x1ae   :  { %v2059_v34 = vpop.f32.mrf.mxu1 }
 0x1af   :  { %v1477_v34 = vmul.f32 0.0009765625, %v1476_v19 }
 0x1b5   :  { %v692_v35 = vpop.f32.mrf.mxu0 }
 0x1b6   :  { %v693_v37 = vadd.f32 %v692_v35, %v574_v30 }
 0x1b7   :  { %v2024_v39 = vpop.f32.mrf.mxu0 }
 0x1b8   :  { %v780_v40 = vadd.f32 %v779_v16, %v693_v37 }
 0x1ba   :  { %v1425_v23 = vmul.f32 %v780_v40, %v780_v40 }
 0x1bc   :  { %v1426_v43 = vmul.f32 0.1, %v1425_v23 }
 0x1ce   :  { %v1022_v44 = vpop.f32.mrf.mxu1 }
 0x1d0   :  { %v2129_v45 = vpop.f32.mrf.mxu1 }
 0x1d7   :  { %v871_v48 = vpop.f32.mrf.mxu0 }
 0x1d8   :  { %v1023_v10 = vadd.f32 %v1022_v44, %v871_v48 }
 0x1d9   :  { %v2094_v51 = vpop.f32.mrf.mxu0 }
 0x1f0   :  { %v1215_v52 = vpop.f32.mrf.mxu1 }
 0x1f2   :  { %v2199_v58 = vpop.f32.mrf.mxu1 }
 0x1f9   :  { %v1126_v59 = vpop.f32.mrf.mxu0 }
 0x1fa   :  { %v1127_v18 = vadd.f32 %v1126_v59, %v1023_v10 }
 0x1fb   :  { %v2164_v6 = vpop.f32.mrf.mxu0 }
 0x1fc   :  { %v1216_v28 = vadd.f32 %v1215_v52, %v1127_v18 }
 0x212   :  { %v1421_v7 = vpop.f32.mrf.mxu1 }
 0x214   :  { %v2269_v11 = vpop.f32.mrf.mxu1 }
 0x21a   :  { %v1334_v33 = vpop.f32.mrf.mxu0 }
 0x21b   :  { %v1335_v36 = vadd.f32 %v1334_v33, %v1216_v28 }
 0x21c   :  { %v2234_v41 = vpop.f32.mrf.mxu0 }
 0x21d   :  { %v1422_v47 = vadd.f32 %v1421_v7, %v1335_v36 }
 0x21f   :  { %v1427_v50 = vsub.f32 %v1422_v47, %v1426_v43 }
 0x221   :  { %v1428_v55 = vmul.f32 0.11111111, %v1427_v50 }
 0x223   :  { %1434 = vrot.lane.b32.xlu0 %v1428_v55, %s2332_s0 }
 0x227   :  { %1454 = vrot.lane.b32.xlu0 %v35_v60, %s2333_s1 }
 0x22b   :  { %1456 = vrot.lane.b32.xlu0 %v2281_v8, %s2333_s1 }
 0x295   :  { %v1435_v57 = vpop.permute.xlu0 %1434 }
 0x296   :  { %1438 = vperm.xlu1 %2279, %v1435_v57  }
 0x299   :  { %v1455_v49 = vpop.permute.xlu0 %1454 }
 0x29a   :  { %1431 = vperm.xlu1 %2279, %v1428_v55   ;;  %v1463_v56 = vsub.f32 %v1455_v49, %v35_v60 }
 0x29c   :  { %v1464_v5 = vand.u32 2147483647, %v1463_v56 }
 0x29d   :  { %v1457_v61 = vpop.permute.xlu0 %1456 }
 0x29e   :  { %1441 = vrot.lane.b32.xlu1 %v1428_v55, %s2334_s19  ;;  %v1466_v0 = vsub.f32 %v1457_v61, %v2281_v8  ;;  %v1465_v3 = vmul.f32 %v1644_v31, %v1464_v5 }
 0x2a0   :  { %v1467_v12 = vand.u32 2147483647, %v1466_v0 }
 0x2a2   :  { %v1468_v4 = vmul.f32 %v1644_v31, %v1467_v12 }
 0x2a4   :  { %v1478_v21 = vsub.f32 %v1465_v3, %v1468_v4  ;;  %v1472_v29 = vmax.f32 %v1468_v4, 0.12 }
 0x2a6   :  { %v1479_v20 = vmul.f32 %v1478_v21, %v1478_v21 }
 0x2a8   :  { %v1480_v35 = vmul.f32 0.0002952756, %v1479_v20 }
 0x2aa   :  { %v1481_v48 = vadd.f32 %v1480_v35, %v1477_v34 }
 0x311   :  { %v1439_v9 = vpop.permute.xlu1 %1438 }
 0x315   :  { %v1432_v14 = vpop.permute.xlu1 %1431 }
 0x319   :  { %v1442_v38 = vpop.permute.xlu1 %1441 }
 0x31a   :  { %v1445_v54 = vsel %vm1444_vm4, %v1439_v9, %v1442_v38 }
 0x31b   :  { %v1446_v63 = vsel %vm1443_vm13, %v1432_v14, %v1445_v54 }
 0x31c   :  { %1447 = vmax.xlane.f32.xlu1 %v1446_v63 }
 0x3a5   :  { %v1448_v62 = vpop.xlane.xlu1 %1447 }
 0x3a6   :  { %v1449_v42 = vadd.f32 1e-08, %v1448_v62 }
 0x3a8   :  { %v1450_v46 = vmul.f32 0.1, %v1449_v42 }
 0x3aa   :  { %vm1451_vm0 = vcmp.lt.f32.partialorder %v1446_v63, %v1450_v46 }
 0x3ab   :  { %v1643_v53 = vsel %vm1451_vm0, 1.0, %v2328_v1 }
 0x3ac   :  { %1458 = vrot.lane.b32.xlu0 %v1643_v53, %s2333_s1 }
 0x3b0   :  { %1500 = vrot.lane.b32.xlu0 %v1463_v56, %s2333_s1 }
 0x41e   :  { %v1459_v13 = vpop.permute.xlu0 %1458 }
 0x41f   :  { %v1469_v15 = vmul.f32 %v1644_v31, %v1459_v13  ;;  %v1470_v17 = vsub.f32 1.0, %v1459_v13 }
 0x421   :  { %v1471_v22 = vmul.f32 %v1644_v31, %v1470_v17  ;;  %v1482_v24 = vmul.f32 %v1469_v15, %v1465_v3 }
 0x422   :  { %v1501_v25 = vpop.permute.xlu0 %1500 }
 0x423   :  { %v1473_v30 = vmul.f32 %v1471_v22, %v1465_v3  ;;  %v1483_v32 = vmul.f32 %v1482_v24, %v1482_v24  ;;  %v1502_v16 = vsub.f32 %v1501_v25, %v1463_v56 }
 0x425   :  { %v1503_v37 = vmul.f32 %v1645_v27, %v1502_v16  ;;  %v1474_v39 = vsub.f32 %v1473_v30, %v1472_v29  ;;  %v1484_v40 = vmul.f32 0.000492126, %v1483_v32 }
 0x427   :  { %v1504_v44 = vmul.f32 %v1503_v37, %v1503_v37  ;;  %v1475_v45 = vmax.f32 %v1474_v39, 0.0  ;;  %v1485_v52 = vadd.f32 %v1484_v40, %v1481_v48 }
 0x429   :  { %1505 = vadd.xlane.f32.xlu0 %v1504_v44  ;;  %v1486_v51 = vmul.f32 %v1475_v45, %v1475_v45 }
 0x42b   :  { %v1487_v58 = vmul.f32 0.0001230315, %v1486_v51 }
 0x42d   :  { %v1488_v59 = vadd.f32 %v1487_v58, %v1485_v52 }
 0x42f   :  { %1489 = vadd.xlane.f32.xlu1 %v1488_v59 }
 0x4b2   :  { %v1506_v6 = vpop.xlane.xlu0 %1505 }
 0x4b3   :  { %v1507_v1 = vrot.slane %v1506_v6, 4 }
 0x4b5   :  { %v1508_v7 = vadd.f32 %v1507_v1, %v1506_v6 }
 0x4b7   :  { %v1509_v10 = vrot.slane %v1508_v7, 2 }
 0x4b8   :  { %v1490_v11 = vpop.xlane.xlu1 %1489 }
 0x4b9   :  { %v1510_v18 = vadd.f32 %v1509_v10, %v1508_v7  ;;  %v1491_v23 = vrot.slane %v1490_v11, 4 }
 0x4bb   :  { %v1511_v28 = vrot.slane %v1510_v18, 1  ;;  %v1492_v33 = vadd.f32 %v1491_v23, %v1490_v11 }
 0x4bd   :  { %v1512_v36 = vadd.f32 %v1511_v28, %v1510_v18  ;;  %v1493_v41 = vrot.slane %v1492_v33, 2 }
 0x4bf   :  { %v1513_v43 = vmul.f32 4.9603175e-05, %v1512_v36  ;;  %v1494_v47 = vadd.f32 %v1493_v41, %v1492_v33 }
 0x4c1   :  { %v1495_v50 = vrot.slane %v1494_v47, 1  ;;  %v1514_v55 = vmul.f32 0.1, %v1513_v43  ;;  %v1519_v60 = vsel %vm1518_vm6, %v1513_v43, 0.0 }
 0x4c3   :  { %v1496_v57 = vadd.f32 %v1495_v50, %v1494_v47 }
 0x4c5   :  { %v1515_v8 = vadd.f32 %v1514_v55, %v1496_v57  ;;  %v1517_v9 = vsel %vm1516_vm8, %v1496_v57, 0.0 }
 0x4c6   :  { %v1520_v14 = vadd.f32 %v1519_v60, %v1517_v9 }
 0x4c7   :  { %v1522_v38 = vsel %vm1521_vm12, %v1515_v8, 0.0 }
 0x4c8   :  { %v1523_v54 = vadd.f32 %v1522_v38, %v1520_v14 }
 0x4ca   :  { %1524 = vst [vmem:[%s3337_s2] sm:$0x1] %v1523_v54 }
 0x4cb   :  { %1529 = vsyncpa [#allocation3], 1 }
 0x4cc   :  { %1530 = vsyncpa [#allocation5], 1 }

</bundles_post_ra>
